<compile_context>
chip_gen: v7x
topology: tpu7x:2x2x1
jax: 0.10.0
libtpu: 0.0.40
codegen_flags: <defaults>
</compile_context>

<pallas_src>
import functools

import jax
import jax.numpy as jnp
from jax import lax
from jax.experimental import pallas as pl
from jax.experimental.pallas import tpu as pltpu

ALPHA = 0.2  # LeakyReLU negative slope used by the GAT attention.


def _gat_spatial_kernel(x_ref, mw_ref, mb_ref, wcat_ref, wasrc_ref, wadst_ref,
                        iw_ref, ib_ref, o_ref, *, nheads, t_steps):
    """One batch element, all heads, of the spatial GAT layer.

    x_ref     : (T, HW)          image slab for this batch (flattened pixels)
    mw_ref    : (HW, N)          pixel -> vertex mapping weight (transposed)
    mb_ref    : (1, N)           pixel -> vertex mapping bias
    wcat_ref  : (T, nheads*T)    per-head feature transforms, concatenated
    wasrc_ref : (T, nheads)      column k = W_k @ a_src_k^T  (precomputed)
    wadst_ref : (T, nheads)      column k = W_k @ a_dst_k^T  (precomputed)
    iw_ref    : (N, HW)          vertex -> pixel mapping weight (transposed)
    ib_ref    : (1, HW)          vertex -> pixel mapping bias
    o_ref     : (nheads*T, HW)   output slab for this batch (heads stacked)
    """
    x = x_ref[...]                                                 # (T, HW)

    # pixels -> vertices (head-invariant, computed once per batch).
    v = jnp.dot(x, mw_ref[...], preferred_element_type=jnp.float32)
    v = v + mb_ref[...]                                            # (T, N)

    # All-head vertex feature transform: h_cat[:, k*T:(k+1)*T] = v^T @ W_k.
    # Contracting dim 0 of v absorbs the transpose into the MXU operand feed.
    h_cat = lax.dot_general(v, wcat_ref[...],
                            (((0,), (0,)), ((), ())),
                            preferred_element_type=jnp.float32)    # (N, nheads*T)

    # Attention scalar projections for all heads at once:
    #   f_src[:, k] = v^T @ (W_k a_src_k^T),  f_dst_rows[k, :] = (W_k a_dst_k^T)^T v
    f_src = lax.dot_general(v, wasrc_ref[...],
                            (((0,), (0,)), ((), ())),
                            preferred_element_type=jnp.float32)    # (N, nheads)
    f_dst_rows = lax.dot_general(wadst_ref[...], v,
                                 (((0,), (0,)), ((), ())),
                                 preferred_element_type=jnp.float32)  # (nheads, N)

    hpT_parts = []
    for k in range(nheads):                     # static unroll, nheads is small
        h_k = h_cat[:, k * t_steps:(k + 1) * t_steps]              # (N, T)

        # GAT logits: e_ij = LeakyReLU(a_src . h_i + a_dst . h_j)
        e = f_src[:, k:k + 1] + f_dst_rows[k:k + 1, :]             # (N, N)
        e = jnp.where(e > 0, e, ALPHA * e)

        # row softmax over neighbours (fully-connected graph).
        e = e - jnp.max(e, axis=-1, keepdims=True)
        p = jnp.exp(e)
        inv_l = pl.reciprocal(jnp.sum(p, axis=-1, keepdims=True), approx=True)
        att = p * inv_l                                            # (N, N)

        # hp^T directly: hp = att @ h_k, computed transposed so the later
        # vertex->pixel matmul needs no explicit transpose.
        hpT = lax.dot_general(h_k, att, (((0,), (1,)), ((), ())),
                              preferred_element_type=jnp.float32)  # (T, N)
        # ELU (clamped exp avoids spurious overflow on the positive branch).
        hpT = jnp.where(hpT > 0, hpT, jnp.exp(jnp.minimum(hpT, 0.0)) - 1.0)
        hpT_parts.append(hpT)

    hpT_all = jnp.concatenate(hpT_parts, axis=0)                   # (nheads*T, N)

    # vertices -> pixels, batched over all heads: one M = nheads*T matmul.
    y = jnp.dot(hpT_all, iw_ref[...], preferred_element_type=jnp.float32)
    y = y + ib_ref[...]                                            # (nheads*T, HW)

    o_ref[...] = y


def spatial_model_forward(x, params):
    """x: (B, T, H, W) float32.  Returns (B, nheads*T, H, W) float32."""
    B, T, H, W = x.shape
    HW = H * W
    map_w = params["map_w"]          # (HW, N)
    map_b = params["map_b"]          # (1, N)
    head_w = params["head_w"]        # (nheads, T, T)
    a_src = params["a_src"]          # (nheads, 1, T)
    a_dst = params["a_dst"]          # (nheads, 1, T)
    inv_w = params["inv_w"]          # (N, HW)
    inv_b = params["inv_b"]          # (1, HW)
    N = map_w.shape[1]
    nheads = head_w.shape[0]

    x_flat = x.reshape(B, T, HW).astype(jnp.float32)

    # Wrapper-side (tiny, one-off) parameter repacking:
    #   w_cat[:, k*T:(k+1)*T] = W_k           (all heads side by side)
    #   wa_src[:, k]          = W_k @ a_src_k^T
    #   wa_dst[:, k]          = W_k @ a_dst_k^T
    w_cat = jnp.transpose(head_w, (1, 0, 2)).reshape(T, nheads * T)
    wa_src = jnp.einsum('ktu,ku->tk', head_w, a_src[:, 0, :])      # (T, nheads)
    wa_dst = jnp.einsum('ktu,ku->tk', head_w, a_dst[:, 0, :])      # (T, nheads)

    kernel = functools.partial(_gat_spatial_kernel, nheads=nheads, t_steps=T)

    grid_spec = pltpu.PrefetchScalarGridSpec(
        num_scalar_prefetch=0,
        grid=(B,),
        in_specs=[
            pl.BlockSpec((None, T, HW),      lambda b: (b, 0, 0)),  # x
            pl.BlockSpec((HW, N),            lambda b: (0, 0)),     # map_w
            pl.BlockSpec((1, N),             lambda b: (0, 0)),     # map_b
            pl.BlockSpec((T, nheads * T),    lambda b: (0, 0)),     # w_cat
            pl.BlockSpec((T, nheads),        lambda b: (0, 0)),     # wa_src
            pl.BlockSpec((T, nheads),        lambda b: (0, 0)),     # wa_dst
            pl.BlockSpec((N, HW),            lambda b: (0, 0)),     # inv_w
            pl.BlockSpec((1, HW),            lambda b: (0, 0)),     # inv_b
        ],
        out_specs=pl.BlockSpec((None, nheads * T, HW), lambda b: (b, 0, 0)),
    )

    out = pl.pallas_call(
        kernel,
        out_shape=jax.ShapeDtypeStruct((B, nheads * T, HW), jnp.float32),
        grid_spec=grid_spec,
        compiler_params=pltpu.CompilerParams(
            # batch axis stays parallel so both TCs are busy on v7x megacore.
            dimension_semantics=("parallel",)),
    )(x_flat, map_w, map_b, w_cat, wa_src, wa_dst, inv_w, inv_b)

    # heads concatenated along the channel axis: (B, nheads*T, H, W)
    return out.reshape(B, nheads * T, H, W)


def init_params(key, *, image_height, image_width, n_vertices, time_steps,
                nheads):
    HW = image_height * image_width
    T, N = time_steps, n_vertices
    ks = jax.random.split(key, 7)
    scale = 0.1
    return {
        "map_w":  scale * jax.random.normal(ks[0], (HW, N), jnp.float32),
        "map_b":  scale * jax.random.normal(ks[1], (1, N), jnp.float32),
        "head_w": scale * jax.random.normal(ks[2], (nheads, T, T), jnp.float32),
        "a_src":  scale * jax.random.normal(ks[3], (nheads, 1, T), jnp.float32),
        "a_dst":  scale * jax.random.normal(ks[4], (nheads, 1, T), jnp.float32),
        "inv_w":  scale * jax.random.normal(ks[5], (N, HW), jnp.float32),
        "inv_b":  scale * jax.random.normal(ks[6], (1, HW), jnp.float32),
    }


if __name__ == "__main__":
    # Small shapes consistent with the module: batch=2, time_steps=4,
    # image 16x16, 32 graph vertices, 3 attention heads in the hidden layer.
    B, T, H, W = 2, 4, 16, 16
    N_VERT, NHEADS = 32, 3

    key = jax.random.PRNGKey(0)
    k_x, k_p = jax.random.split(key)
    x = jax.random.normal(k_x, (B, T, H, W), jnp.float32)
    params = init_params(k_p, image_height=H, image_width=W,
                         n_vertices=N_VERT, time_steps=T, nheads=NHEADS)

    fwd = jax.jit(spatial_model_forward)
    y = fwd(x, params)
    jax.block_until_ready(y)
    assert y.shape == (B, NHEADS * T, H, W), y.shape
    print("KERNEL_OK")
</pallas_src>

<mosaic_0001>
module attributes {stable_mosaic.version = 11 : i64} {
  func.func @_gat_spatial_kernel(%arg0: i32, %arg1: memref<1x4x256xf32, #tpu.memory_space<vmem>>, %arg2: memref<256x32xf32, #tpu.memory_space<vmem>>, %arg3: memref<1x32xf32, #tpu.memory_space<vmem>>, %arg4: memref<4x12xf32, #tpu.memory_space<vmem>>, %arg5: memref<4x3xf32, #tpu.memory_space<vmem>>, %arg6: memref<4x3xf32, #tpu.memory_space<vmem>>, %arg7: memref<32x256xf32, #tpu.memory_space<vmem>>, %arg8: memref<1x256xf32, #tpu.memory_space<vmem>>, %arg9: memref<1x12x256xf32, #tpu.memory_space<vmem>>) attributes {dimension_semantics = [#tpu.dimension_semantics<parallel>], iteration_bounds = array<i64: 2>, scalar_prefetch = 0 : i64, scratch_operands = 0 : i64, tpu.core_type = #tpu.core_type<tc>, window_params = [{transform_indices = @transform_0, window_bounds = array<i64: 1, 4, 256>}, {pipeline_mode = #tpu.pipeline_mode<synchronous>, transform_indices = @transform_1, window_bounds = array<i64: 256, 32>}, {pipeline_mode = #tpu.pipeline_mode<synchronous>, transform_indices = @transform_2, window_bounds = array<i64: 1, 32>}, {pipeline_mode = #tpu.pipeline_mode<synchronous>, transform_indices = @transform_3, window_bounds = array<i64: 4, 12>}, {pipeline_mode = #tpu.pipeline_mode<synchronous>, transform_indices = @transform_4, window_bounds = array<i64: 4, 3>}, {pipeline_mode = #tpu.pipeline_mode<synchronous>, transform_indices = @transform_5, window_bounds = array<i64: 4, 3>}, {pipeline_mode = #tpu.pipeline_mode<synchronous>, transform_indices = @transform_6, window_bounds = array<i64: 32, 256>}, {pipeline_mode = #tpu.pipeline_mode<synchronous>, transform_indices = @transform_7, window_bounds = array<i64: 1, 256>}, {transform_indices = @transform_8, window_bounds = array<i64: 1, 12, 256>}]} {
    %c0 = arith.constant 0 : index
    %c0_0 = arith.constant 0 : index
    %c0_1 = arith.constant 0 : index
    %0 = vector.load %arg1[%c0, %c0_0, %c0_1] : memref<1x4x256xf32, #tpu.memory_space<vmem>>, vector<1x4x256xf32>
    %1 = vector.shape_cast %0 : vector<1x4x256xf32> to vector<4x256xf32>
    %c0_2 = arith.constant 0 : index
    %c0_3 = arith.constant 0 : index
    %2 = vector.load %arg2[%c0_2, %c0_3] : memref<256x32xf32, #tpu.memory_space<vmem>>, vector<256x32xf32>
    %cst = arith.constant dense<0.000000e+00> : vector<4x32xf32>
    %3 = tpu.matmul %1, %2, %cst {dimension_numbers = #tpu.dot_dimension_numbers<[1], [0], [0], [1], [0, 0, 1, 1], [], []>} : vector<4x256xf32>, vector<256x32xf32>, vector<4x32xf32> -> vector<4x32xf32>
    %c0_4 = arith.constant 0 : index
    %c0_5 = arith.constant 0 : index
    %4 = vector.load %arg3[%c0_4, %c0_5] : memref<1x32xf32, #tpu.memory_space<vmem>>, vector<1x32xf32>
    %5 = vector.broadcast %4 : vector<1x32xf32> to vector<4x32xf32>
    %6 = arith.addf %3, %5 : vector<4x32xf32>
    %c0_6 = arith.constant 0 : index
    %c0_7 = arith.constant 0 : index
    %7 = vector.load %arg4[%c0_6, %c0_7] : memref<4x12xf32, #tpu.memory_space<vmem>>, vector<4x12xf32>
    %cst_8 = arith.constant dense<0.000000e+00> : vector<32x12xf32>
    %8 = tpu.matmul %6, %7, %cst_8 {dimension_numbers = #tpu.dot_dimension_numbers<[0], [0], [1], [1], [0, 1, 1, 1], [], []>} : vector<4x32xf32>, vector<4x12xf32>, vector<32x12xf32> -> vector<32x12xf32>
    %c0_9 = arith.constant 0 : index
    %c0_10 = arith.constant 0 : index
    %9 = vector.load %arg5[%c0_9, %c0_10] : memref<4x3xf32, #tpu.memory_space<vmem>>, vector<4x3xf32>
    %cst_11 = arith.constant dense<0.000000e+00> : vector<32x3xf32>
    %10 = tpu.matmul %6, %9, %cst_11 {dimension_numbers = #tpu.dot_dimension_numbers<[0], [0], [1], [1], [0, 1, 1, 1], [], []>} : vector<4x32xf32>, vector<4x3xf32>, vector<32x3xf32> -> vector<32x3xf32>
    %c0_12 = arith.constant 0 : index
    %c0_13 = arith.constant 0 : index
    %11 = vector.load %arg6[%c0_12, %c0_13] : memref<4x3xf32, #tpu.memory_space<vmem>>, vector<4x3xf32>
    %cst_14 = arith.constant dense<0.000000e+00> : vector<3x32xf32>
    %12 = tpu.matmul %11, %6, %cst_14 {dimension_numbers = #tpu.dot_dimension_numbers<[0], [0], [1], [1], [0, 1, 1, 1], [], []>} : vector<4x3xf32>, vector<4x32xf32>, vector<3x32xf32> -> vector<3x32xf32>
    %13 = vector.extract_strided_slice %8 {offsets = [0, 0], sizes = [32, 4], strides = [1, 1]} : vector<32x12xf32> to vector<32x4xf32>
    %14 = vector.extract_strided_slice %10 {offsets = [0, 0], sizes = [32, 1], strides = [1, 1]} : vector<32x3xf32> to vector<32x1xf32>
    %15 = vector.extract_strided_slice %12 {offsets = [0, 0], sizes = [1, 32], strides = [1, 1]} : vector<3x32xf32> to vector<1x32xf32>
    %16 = vector.broadcast %14 : vector<32x1xf32> to vector<32x32xf32>
    %17 = vector.broadcast %15 : vector<1x32xf32> to vector<32x32xf32>
    %18 = arith.addf %16, %17 : vector<32x32xf32>
    %cst_15 = arith.constant 0.000000e+00 : f32
    %19 = vector.broadcast %cst_15 : f32 to vector<32x32xf32>
    %20 = arith.cmpf ogt, %18, %19 : vector<32x32xf32>
    %cst_16 = arith.constant 2.000000e-01 : f32
    %21 = vector.broadcast %cst_16 : f32 to vector<32x32xf32>
    %22 = arith.mulf %21, %18 : vector<32x32xf32>
    %23 = arith.select %20, %18, %22 : vector<32x32xi1>, vector<32x32xf32>
    %cst_17 = arith.constant dense<0xFF800000> : vector<32xf32>
    %24 = vector.multi_reduction <maximumf>, %23, %cst_17 [1] : vector<32x32xf32> to vector<32xf32>
    %25 = vector.shape_cast %24 : vector<32xf32> to vector<32x1xf32>
    %26 = vector.broadcast %25 : vector<32x1xf32> to vector<32x32xf32>
    %27 = arith.subf %23, %26 : vector<32x32xf32>
    %28 = math.exp %27 : vector<32x32xf32>
    %cst_18 = arith.constant dense<0.000000e+00> : vector<32xf32>
    %29 = vector.multi_reduction <add>, %28, %cst_18 [1] : vector<32x32xf32> to vector<32xf32>
    %30 = vector.shape_cast %29 : vector<32xf32> to vector<32x1xf32>
    %31 = tpu.reciprocal %30 {approx = true} : vector<32x1xf32> -> vector<32x1xf32>
    %32 = vector.broadcast %31 : vector<32x1xf32> to vector<32x32xf32>
    %33 = arith.mulf %28, %32 : vector<32x32xf32>
    %cst_19 = arith.constant dense<0.000000e+00> : vector<4x32xf32>
    %34 = tpu.matmul %13, %33, %cst_19 {dimension_numbers = #tpu.dot_dimension_numbers<[0], [1], [1], [0], [0, 1, 1, 0], [], []>} : vector<32x4xf32>, vector<32x32xf32>, vector<4x32xf32> -> vector<4x32xf32>
    %cst_20 = arith.constant 0.000000e+00 : f32
    %35 = vector.broadcast %cst_20 : f32 to vector<4x32xf32>
    %36 = arith.cmpf ogt, %34, %35 : vector<4x32xf32>
    %cst_21 = arith.constant 0.000000e+00 : f32
    %37 = vector.broadcast %cst_21 : f32 to vector<4x32xf32>
    %38 = arith.minimumf %34, %37 : vector<4x32xf32>
    %39 = math.exp %38 : vector<4x32xf32>
    %cst_22 = arith.constant 1.000000e+00 : f32
    %40 = vector.broadcast %cst_22 : f32 to vector<4x32xf32>
    %41 = arith.subf %39, %40 : vector<4x32xf32>
    %42 = arith.select %36, %34, %41 : vector<4x32xi1>, vector<4x32xf32>
    %43 = vector.extract_strided_slice %8 {offsets = [0, 4], sizes = [32, 4], strides = [1, 1]} : vector<32x12xf32> to vector<32x4xf32>
    %44 = vector.extract_strided_slice %10 {offsets = [0, 1], sizes = [32, 1], strides = [1, 1]} : vector<32x3xf32> to vector<32x1xf32>
    %45 = vector.extract_strided_slice %12 {offsets = [1, 0], sizes = [1, 32], strides = [1, 1]} : vector<3x32xf32> to vector<1x32xf32>
    %46 = vector.broadcast %44 : vector<32x1xf32> to vector<32x32xf32>
    %47 = vector.broadcast %45 : vector<1x32xf32> to vector<32x32xf32>
    %48 = arith.addf %46, %47 : vector<32x32xf32>
    %cst_23 = arith.constant 0.000000e+00 : f32
    %49 = vector.broadcast %cst_23 : f32 to vector<32x32xf32>
    %50 = arith.cmpf ogt, %48, %49 : vector<32x32xf32>
    %cst_24 = arith.constant 2.000000e-01 : f32
    %51 = vector.broadcast %cst_24 : f32 to vector<32x32xf32>
    %52 = arith.mulf %51, %48 : vector<32x32xf32>
    %53 = arith.select %50, %48, %52 : vector<32x32xi1>, vector<32x32xf32>
    %cst_25 = arith.constant dense<0xFF800000> : vector<32xf32>
    %54 = vector.multi_reduction <maximumf>, %53, %cst_25 [1] : vector<32x32xf32> to vector<32xf32>
    %55 = vector.shape_cast %54 : vector<32xf32> to vector<32x1xf32>
    %56 = vector.broadcast %55 : vector<32x1xf32> to vector<32x32xf32>
    %57 = arith.subf %53, %56 : vector<32x32xf32>
    %58 = math.exp %57 : vector<32x32xf32>
    %cst_26 = arith.constant dense<0.000000e+00> : vector<32xf32>
    %59 = vector.multi_reduction <add>, %58, %cst_26 [1] : vector<32x32xf32> to vector<32xf32>
    %60 = vector.shape_cast %59 : vector<32xf32> to vector<32x1xf32>
    %61 = tpu.reciprocal %60 {approx = true} : vector<32x1xf32> -> vector<32x1xf32>
    %62 = vector.broadcast %61 : vector<32x1xf32> to vector<32x32xf32>
    %63 = arith.mulf %58, %62 : vector<32x32xf32>
    %cst_27 = arith.constant dense<0.000000e+00> : vector<4x32xf32>
    %64 = tpu.matmul %43, %63, %cst_27 {dimension_numbers = #tpu.dot_dimension_numbers<[0], [1], [1], [0], [0, 1, 1, 0], [], []>} : vector<32x4xf32>, vector<32x32xf32>, vector<4x32xf32> -> vector<4x32xf32>
    %cst_28 = arith.constant 0.000000e+00 : f32
    %65 = vector.broadcast %cst_28 : f32 to vector<4x32xf32>
    %66 = arith.cmpf ogt, %64, %65 : vector<4x32xf32>
    %cst_29 = arith.constant 0.000000e+00 : f32
    %67 = vector.broadcast %cst_29 : f32 to vector<4x32xf32>
    %68 = arith.minimumf %64, %67 : vector<4x32xf32>
    %69 = math.exp %68 : vector<4x32xf32>
    %cst_30 = arith.constant 1.000000e+00 : f32
    %70 = vector.broadcast %cst_30 : f32 to vector<4x32xf32>
    %71 = arith.subf %69, %70 : vector<4x32xf32>
    %72 = arith.select %66, %64, %71 : vector<4x32xi1>, vector<4x32xf32>
    %73 = vector.extract_strided_slice %8 {offsets = [0, 8], sizes = [32, 4], strides = [1, 1]} : vector<32x12xf32> to vector<32x4xf32>
    %74 = vector.extract_strided_slice %10 {offsets = [0, 2], sizes = [32, 1], strides = [1, 1]} : vector<32x3xf32> to vector<32x1xf32>
    %75 = vector.extract_strided_slice %12 {offsets = [2, 0], sizes = [1, 32], strides = [1, 1]} : vector<3x32xf32> to vector<1x32xf32>
    %76 = vector.broadcast %74 : vector<32x1xf32> to vector<32x32xf32>
    %77 = vector.broadcast %75 : vector<1x32xf32> to vector<32x32xf32>
    %78 = arith.addf %76, %77 : vector<32x32xf32>
    %cst_31 = arith.constant 0.000000e+00 : f32
    %79 = vector.broadcast %cst_31 : f32 to vector<32x32xf32>
    %80 = arith.cmpf ogt, %78, %79 : vector<32x32xf32>
    %cst_32 = arith.constant 2.000000e-01 : f32
    %81 = vector.broadcast %cst_32 : f32 to vector<32x32xf32>
    %82 = arith.mulf %81, %78 : vector<32x32xf32>
    %83 = arith.select %80, %78, %82 : vector<32x32xi1>, vector<32x32xf32>
    %cst_33 = arith.constant dense<0xFF800000> : vector<32xf32>
    %84 = vector.multi_reduction <maximumf>, %83, %cst_33 [1] : vector<32x32xf32> to vector<32xf32>
    %85 = vector.shape_cast %84 : vector<32xf32> to vector<32x1xf32>
    %86 = vector.broadcast %85 : vector<32x1xf32> to vector<32x32xf32>
    %87 = arith.subf %83, %86 : vector<32x32xf32>
    %88 = math.exp %87 : vector<32x32xf32>
    %cst_34 = arith.constant dense<0.000000e+00> : vector<32xf32>
    %89 = vector.multi_reduction <add>, %88, %cst_34 [1] : vector<32x32xf32> to vector<32xf32>
    %90 = vector.shape_cast %89 : vector<32xf32> to vector<32x1xf32>
    %91 = tpu.reciprocal %90 {approx = true} : vector<32x1xf32> -> vector<32x1xf32>
    %92 = vector.broadcast %91 : vector<32x1xf32> to vector<32x32xf32>
    %93 = arith.mulf %88, %92 : vector<32x32xf32>
    %cst_35 = arith.constant dense<0.000000e+00> : vector<4x32xf32>
    %94 = tpu.matmul %73, %93, %cst_35 {dimension_numbers = #tpu.dot_dimension_numbers<[0], [1], [1], [0], [0, 1, 1, 0], [], []>} : vector<32x4xf32>, vector<32x32xf32>, vector<4x32xf32> -> vector<4x32xf32>
    %cst_36 = arith.constant 0.000000e+00 : f32
    %95 = vector.broadcast %cst_36 : f32 to vector<4x32xf32>
    %96 = arith.cmpf ogt, %94, %95 : vector<4x32xf32>
    %cst_37 = arith.constant 0.000000e+00 : f32
    %97 = vector.broadcast %cst_37 : f32 to vector<4x32xf32>
    %98 = arith.minimumf %94, %97 : vector<4x32xf32>
    %99 = math.exp %98 : vector<4x32xf32>
    %cst_38 = arith.constant 1.000000e+00 : f32
    %100 = vector.broadcast %cst_38 : f32 to vector<4x32xf32>
    %101 = arith.subf %99, %100 : vector<4x32xf32>
    %102 = arith.select %96, %94, %101 : vector<4x32xi1>, vector<4x32xf32>
    %103 = tpu.concatenate %42, %72, %102 in 0 : vector<4x32xf32>, vector<4x32xf32>, vector<4x32xf32> -> vector<12x32xf32>
    %c0_39 = arith.constant 0 : index
    %c0_40 = arith.constant 0 : index
    %104 = vector.load %arg7[%c0_39, %c0_40] : memref<32x256xf32, #tpu.memory_space<vmem>>, vector<32x256xf32>
    %cst_41 = arith.constant dense<0.000000e+00> : vector<12x256xf32>
    %105 = tpu.matmul %103, %104, %cst_41 {dimension_numbers = #tpu.dot_dimension_numbers<[1], [0], [0], [1], [0, 0, 1, 1], [], []>} : vector<12x32xf32>, vector<32x256xf32>, vector<12x256xf32> -> vector<12x256xf32>
    %c0_42 = arith.constant 0 : index
    %c0_43 = arith.constant 0 : index
    %106 = vector.load %arg8[%c0_42, %c0_43] : memref<1x256xf32, #tpu.memory_space<vmem>>, vector<1x256xf32>
    %107 = vector.broadcast %106 : vector<1x256xf32> to vector<12x256xf32>
    %108 = arith.addf %105, %107 : vector<12x256xf32>
    %c0_44 = arith.constant 0 : index
    %c0_45 = arith.constant 0 : index
    %c0_46 = arith.constant 0 : index
    %109 = vector.load %arg9[%c0_44, %c0_45, %c0_46] : memref<1x12x256xf32, #tpu.memory_space<vmem>>, vector<1x12x256xf32>
    %110 = vector.shape_cast %109 : vector<1x12x256xf32> to vector<12x256xf32>
    %111 = vector.shape_cast %108 : vector<12x256xf32> to vector<1x12x256xf32>
    tpu.vector_store %arg9[%c0_44, %c0_45, %c0_46], %111 {strides = array<i32>} : memref<1x12x256xf32, #tpu.memory_space<vmem>>, vector<1x12x256xf32>,
    return
  }
  func.func @transform_0(%arg0: i32) -> (i32, i32, i32) {
    %c0_i32 = arith.constant 0 : i32
    %c0_i32_0 = arith.constant 0 : i32
    %c0_i32_1 = arith.constant 0 : i32
    return %arg0, %c0_i32, %c0_i32_0 : i32, i32, i32
  }
  func.func @transform_1(%arg0: i32) -> (i32, i32) {
    %c0_i32 = arith.constant 0 : i32
    %c0_i32_0 = arith.constant 0 : i32
    %c0_i32_1 = arith.constant 0 : i32
    return %c0_i32, %c0_i32_0 : i32, i32
  }
  func.func @transform_2(%arg0: i32) -> (i32, i32) {
    %c0_i32 = arith.constant 0 : i32
    %c0_i32_0 = arith.constant 0 : i32
    %c0_i32_1 = arith.constant 0 : i32
    return %c0_i32, %c0_i32_0 : i32, i32
  }
  func.func @transform_3(%arg0: i32) -> (i32, i32) {
    %c0_i32 = arith.constant 0 : i32
    %c0_i32_0 = arith.constant 0 : i32
    %c0_i32_1 = arith.constant 0 : i32
    return %c0_i32, %c0_i32_0 : i32, i32
  }
  func.func @transform_4(%arg0: i32) -> (i32, i32) {
    %c0_i32 = arith.constant 0 : i32
    %c0_i32_0 = arith.constant 0 : i32
    %c0_i32_1 = arith.constant 0 : i32
    return %c0_i32, %c0_i32_0 : i32, i32
  }
  func.func @transform_5(%arg0: i32) -> (i32, i32) {
    %c0_i32 = arith.constant 0 : i32
    %c0_i32_0 = arith.constant 0 : i32
    %c0_i32_1 = arith.constant 0 : i32
    return %c0_i32, %c0_i32_0 : i32, i32
  }
  func.func @transform_6(%arg0: i32) -> (i32, i32) {
    %c0_i32 = arith.constant 0 : i32
    %c0_i32_0 = arith.constant 0 : i32
    %c0_i32_1 = arith.constant 0 : i32
    return %c0_i32, %c0_i32_0 : i32, i32
  }
  func.func @transform_7(%arg0: i32) -> (i32, i32) {
    %c0_i32 = arith.constant 0 : i32
    %c0_i32_0 = arith.constant 0 : i32
    %c0_i32_1 = arith.constant 0 : i32
    return %c0_i32, %c0_i32_0 : i32, i32
  }
  func.func @transform_8(%arg0: i32) -> (i32, i32, i32) {
    %c0_i32 = arith.constant 0 : i32
    %c0_i32_0 = arith.constant 0 : i32
    %c0_i32_1 = arith.constant 0 : i32
    return %arg0, %c0_i32, %c0_i32_0 : i32, i32, i32
  }
}

</mosaic_0001>

<bundles_post_ra>
// kernel: spatial_model_forward.1
= control target key start
LH: loop header
LB: loop body
LE: loop exit
PB: predicated region body
PF: predicated region fallthrough
CT: control target
= control target key end

     0   :  { %s1935_s27 = smov 0   ;;  %s2327_s0 = inlined_call_operand.vmem [shape: f32[2,4,256], index: 0, kind: input, shape index: {}]   ;;  %s2328_s1 = inlined_call_operand.vmem [shape: f32[256,32], index: 1, kind: input, shape index: {}]   ;;  %s2329_s2 = inlined_call_operand.vmem [shape: f32[1,32], index: 2, kind: input, shape index: {}]   ;;  %s2330_s3 = inlined_call_operand.vmem [shape: f32[4,12], index: 3, kind: input, shape index: {}]   ;;  %s2331_s4 = inlined_call_operand.vmem [shape: f32[4,3], index: 4, kind: input, shape index: {}]   ;;  %s2332_s5 = inlined_call_operand.vmem [shape: f32[4,3], index: 5, kind: input, shape index: {}]   ;;  %s2333_s6 = inlined_call_operand.vmem [shape: f32[32,256], index: 6, kind: input, shape index: {}]   ;;  %s2334_s7 = inlined_call_operand.vmem [shape: f32[1,256], index: 7, kind: input, shape index: {}]   ;;  %s2335_s8 = inlined_call_operand.vmem [shape: f32[2,12,256], index: 8, kind: output, shape index: {}]  }
   0x1 LB: > { %s1560_s28 = sadd.s32 4294967295, %s1880_s27   ;;  %p1564_p0 = scmp.ge.s32.totalorder %s1880_s27, 1  ;;  %s1880_s27 = sphi %s1935_s27, %s18_s27  }
   0x2   : > { %p262_p1 = scmp.lt.s32.totalorder %s1880_s27, 3 }
   0x4   : > { %p263_p2 = pnand %p1564_p0, %p262_p1 }
   0x5   : > { %v323_v0 = vld [vmem:[%s2328_s1 + $0x80] sm:$0xff] (!%p263_p2)  ;;  %v324_v1 = vld [vmem:[%s2328_s1 + $0x88] sm:$0xff] (!%p263_p2)  ;;  %p296_p3 = scmp.lt.s32.totalorder (!%p263_p2), %s1560_s28, 1  ;;  %v325_v5 = vld [vmem:[%s2328_s1 + $0x90] sm:$0xff] (!%p263_p2)  ;;  %vm465_vm0 = vcmask (!%p263_p2), 1043456   ;;  %vm1882_vm1 = vmmov (!%p263_p2), 0  }
   0x6   : > { %266 = sbr.rel (%p263_p2) target bundleno = 1645 (0x66d), region = 52  ;;  %v307_v2 = vld [vmem:[%s2328_s1] sm:$0xff] (!%p263_p2)  ;;  %v1722_v3 = vpack.c.bf16 (!%p263_p2), %v324_v1, %v323_v0  ;;  %v308_v4 = vld [vmem:[%s2328_s1 + $0x8] sm:$0xff] (!%p263_p2)  ;;  %v326_v6 = vld [vmem:[%s2328_s1 + $0x98] sm:$0xff] (!%p263_p2)  ;;  %v1883_v58 = vmov (!%p263_p2), 0.0   ;;  %vm452_vm2 = vcmask (!%p263_p2), 31744  }
   0x7   : > { %v1724_v7 = vpack.c.bf16 (!%p263_p2), %v308_v4, %v307_v2  ;;  %v1726_v8 = vpack.c.bf16 (!%p263_p2), %v326_v6, %v325_v5  ;;  %v309_v9 = vld [vmem:[%s2328_s1 + $0x10] sm:$0xff] (!%p263_p2)  ;;  %v310_v10 = vld [vmem:[%s2328_s1 + $0x18] sm:$0xff] (!%p263_p2)  ;;  %v327_v11 = vld [vmem:[%s2328_s1 + $0xa0] sm:$0xff] (!%p263_p2)  ;;  %v1884_v0 = vmov (!%p263_p2), 0   ;;  %v1885_v1 = vmov (!%p263_p2), 1   ;;  %s1886_s23 = smov (!%p263_p2), 124  }
   0x8   : > { %1723 = vmatprep.subr.bf16.mxu0 (!%p263_p2), %v1722_v3  ;;  %v328_v12 = vld [vmem:[%s2328_s1 + $0xa8] sm:$0xff] (!%p263_p2)  ;;  %v1728_v13 = vpack.c.bf16 (!%p263_p2), %v310_v10, %v309_v9  ;;  %v311_v15 = vld [vmem:[%s2328_s1 + $0x20] sm:$0xff] (!%p263_p2)  ;;  %v329_v17 = vld [vmem:[%s2328_s1 + $0xb0] sm:$0xff] (!%p263_p2)  ;;  %1806 = vset.pattern.permute.xlu1 (!%p263_p2), %v1884_v0  ;;  %v1887_v9 = vmov (!%p263_p2), 2   ;;  %s1888_s24 = smov (!%p263_p2), 120   ;;  %vm792_vm4 = vcmask (!%p263_p2), 261120  }
   0x9   : > { %1725 = vmatpush3.bf16.msra.mxu0 (!%p263_p2), %v1724_v7  ;;  %v1730_v14 = vpack.c.bf16 (!%p263_p2), %v328_v12, %v327_v11  ;;  %v312_v16 = vld [vmem:[%s2328_s1 + $0x28] sm:$0xff] (!%p263_p2)  ;;  %v330_v18 = vld [vmem:[%s2328_s1 + $0xb8] sm:$0xff] (!%p263_p2)  ;;  %v313_v21 = vld [vmem:[%s2328_s1 + $0x30] sm:$0xff] (!%p263_p2) }
   0xa   : > { %1727 = vmatprep.subr.bf16.mxu0 (!%p263_p2), %v1726_v8  ;;  %v1732_v19 = vpack.c.bf16 (!%p263_p2), %v312_v16, %v311_v15  ;;  %v1734_v20 = vpack.c.bf16 (!%p263_p2), %v330_v18, %v329_v17  ;;  %v314_v22 = vld [vmem:[%s2328_s1 + $0x38] sm:$0xff] (!%p263_p2)  ;;  %v331_v23 = vld [vmem:[%s2328_s1 + $0xc0] sm:$0xff] (!%p263_p2)  ;;  %v332_v24 = vld [vmem:[%s2328_s1 + $0xc8] sm:$0xff] (!%p263_p2) }
   0xb   : > { %v1736_v27 = vpack.c.bf16 (!%p263_p2), %v314_v22, %v313_v21  ;;  %v1738_v28 = vpack.c.bf16 (!%p263_p2), %v332_v24, %v331_v23  ;;  %v315_v29 = vld [vmem:[%s2328_s1 + $0x40] sm:$0xff] (!%p263_p2)  ;;  %v316_v30 = vld [vmem:[%s2328_s1 + $0x48] sm:$0xff] (!%p263_p2)  ;;  %v333_v31 = vld [vmem:[%s2328_s1 + $0xd0] sm:$0xff] (!%p263_p2) }
   0xc   : > { %v334_v32 = vld [vmem:[%s2328_s1 + $0xd8] sm:$0xff] (!%p263_p2)  ;;  %v1740_v33 = vpack.c.bf16 (!%p263_p2), %v316_v30, %v315_v29  ;;  %v317_v35 = vld [vmem:[%s2328_s1 + $0x50] sm:$0xff] (!%p263_p2)  ;;  %v335_v37 = vld [vmem:[%s2328_s1 + $0xe0] sm:$0xff] (!%p263_p2) }
   0xd   : > { %s2339_s28 = smov (!%p296_p3, %s1560_s28), 1  ;;  %1729 = vmatpush3.bf16.msra.mxu0 %v1728_v13  ;;  %v1742_v34 = vpack.c.bf16 %v334_v32, %v333_v31  ;;  %v318_v36 = vld [vmem:[%s2328_s1 + $0x58] sm:$0xff]  ;;  %v336_v38 = vld [vmem:[%s2328_s1 + $0xe8] sm:$0xff]  ;;  %v319_v41 = vld [vmem:[%s2328_s1 + $0x60] sm:$0xff]  ;;  %v772_v13 = vlaneseq }
   0xe   : > { %s1604_s29 = sshll.u32 %s2339_s28, 3  ;;  %1731 = vmatprep.subr.bf16.mxu0 %v1730_v14  ;;  %v1744_v39 = vpack.c.bf16 %v318_v36, %v317_v35  ;;  %v1746_v40 = vpack.c.bf16 %v336_v38, %v335_v37  ;;  %v320_v42 = vld [vmem:[%s2328_s1 + $0x68] sm:$0xff]  ;;  %v337_v43 = vld [vmem:[%s2328_s1 + $0xf0] sm:$0xff]  ;;  %v338_v44 = vld [vmem:[%s2328_s1 + $0xf8] sm:$0xff] }
   0xf   : > { %s300_s18 = scalar_lea.vmem %s2327_s0, %s1604_s29  ;;  %v1748_v45 = vpack.c.bf16 %v320_v42, %v319_v41  ;;  %v1750_v46 = vpack.c.bf16 %v338_v44, %v337_v43  ;;  %v321_v47 = vld [vmem:[%s2328_s1 + $0x70] sm:$0xff]  ;;  %v322_v48 = vld [vmem:[%s2328_s1 + $0x78] sm:$0xff]  ;;  %v1569_v52 = vld [vmem:[%s2329_s2] ss:$0 sm:$0xff]  ;;  %v2096_v14 = vshrl.u32 %v772_v13, 7 }
  0x10   : > { %v306_v25 = vld [vmem:[%s300_s18] sm:$0xff]  ;;  %v1752_v49 = vpack.c.bf16 %v322_v48, %v321_v47 }
  0x11   : > { %v347_v26 = vcombine.high %v306_v25, %v306_v25  ;;  %1733 = vmatpush3.bf16.msra.mxu0 %v1732_v19  ;;  %v419_v55 = vld [vmem:[%s2330_s3] sm:$0xf]  ;;  %v774_v15 = vsub.s32 0, %v2096_v14  ;;  %v978_v24 = vsub.s32 1, %v2096_v14  ;;  %v1197_v29 = vsub.s32 2, %v2096_v14 }
  0x12   : > { %1735 = vmatprep.subr.bf16.mxu0 %v1734_v20  ;;  %1668 = vmatprep.subr.msk.mxu1 %vm465_vm0, %v419_v55  ;;  %v554_v56 = vld [vmem:[%s2331_s4] sm:$0xf] }
  0x13   : > { %413 = vmatprep.mubr.f32.mxu0 %v347_v26  ;;  %1669 = vmatpush3.msk.msra.mxu1 %vm465_vm0, %v419_v55  ;;  %v643_v57 = vld [vmem:[%s2332_s5] sm:$0xf] }
  0x14   : > { %1676 = vmatprep.subr.msk.mxu1 %vm465_vm0, %v554_v56 }
  0x15   : > { %1737 = vmatpush3.bf16.msra.mxu0 %v1736_v27 }
  0x16   : > { %1739 = vmatprep.subr.bf16.mxu0 %v1738_v28 }
  0x19   : > { %1741 = vmatpush3.bf16.msra.mxu0 %v1740_v33 }
  0x1a   : > { %1743 = vmatprep.subr.bf16.mxu0 %v1742_v34 }
  0x1d   : > { %1745 = vmatpush3.bf16.msra.mxu0 %v1744_v39 }
  0x1e   : > { %1747 = vmatprep.subr.bf16.mxu0 %v1746_v40 }
  0x21   : > { %1749 = vmatpush3.bf16.msra.mxu0 %v1748_v45 }
  0x22   : > { %1751 = vmatprep.subr.bf16.mxu0 %v1750_v46 }
  0x25   : > { %1753 = vmatpush3.bf16.msra.mxu0 %v1752_v49 }
  0x28   : > { %414 = vmatmul.mubr.f32.vlgmr.msra.gmra.mrb[0].mxu0 %v306_v25 }
  0x29   : > { %1708 = vmatprep.mubr.msk.f32.mxu0 %vm1882_vm1, %v1883_v58 }
  0xfb   : > { %v1638_v50 = vpop.f32.mrb[0].mxu0 }
  0xfc   : > { %v1639_v51 = vpop.f32.mrb[1].mxu0 }
  0xfd   : > { %v1640_v53 = vadd.f32 %v1639_v51, %v1638_v50 }
  0xff   : > { %v416_v54 = vadd.f32 %v1640_v53, %v1569_v52 }
 0x101   : > { %420 = vxpose.xlu0.b32.start.end [1/1] (short) (narrow) %v416_v54, 32 }
 0x10e   : > { %644 = vxpose.xlu0.b32.start.end [1/1] (short) (narrow) %v643_v57, 8 }
 0x137   : > { %1807 = vset.pattern.permute.xlu0 %v1885_v1 }
 0x181   : > { %v436_v59 = vpop.trf.xlu0 }
 0x182   : > { %1670 = vmatprep.mubr.msk.f32.mxu1 %vm452_vm2, %v436_v59 }
 0x185   : > { %v437_v60 = vpop.trf.xlu0 }
 0x186   : > { %1671 = vmatmul.mubr.msk.f32.vlgmr.msra.gmra.mrb[0].mxu1 %vm452_vm2, %v437_v60 }
 0x187   : > { %1677 = vmatpush3.msk.msra.mxu1 %vm465_vm0, %v554_v56 }
 0x188   : > { %1684 = vmatprep.subr.mxu1 %v1883_v58 }
 0x189   : > { %v438_v61 = vpop.trf.xlu0 }
 0x18a   : > { %1673 = vmatprep.mubr.msk.f32.mxu1 %vm452_vm2, %v438_v61 }
 0x18d   : > { %v439_v62 = vpop.trf.xlu0 }
 0x18e   : > { %1674 = vmatmul.mubr.msk.f32.gmra.mrb[2].mxu1 %vm452_vm2, %v439_v62 }
 0x18f   : > { %1678 = vmatprep.mubr.msk.f32.mxu1 %vm452_vm2, %v436_v59 }
 0x191   : > { %v660_v63 = vpop.trf.xlu0 }
 0x192   : > { %1679 = vmatmul.mubr.msk.f32.vlgmr.msra.gmra.mrb[4].mxu1 %vm452_vm2, %v437_v60 }
 0x193   : > { %1685 = vmatpush3.msk.msra.mxu1 %vm465_vm0, %v416_v54  ;;  %1681 = vmatprep.mubr.msk.f32.mxu1 %vm452_vm2, %v438_v61 }
 0x196   : > { %1682 = vmatmul.mubr.msk.f32.gmra.mrb[6].mxu1 %vm452_vm2, %v439_v62 }
 0x197   : > { %1686 = vmatprep.mubr.msk.f32.mxu1 %vm1882_vm1, %v1883_v58 }
 0x19a   : > { %1687 = vmatmul.mubr.msk.f32.vlgmr.msra.gmra.mrb[8].mxu1 %vm452_vm2, %v660_v63  ;;  %vm2248_vm2 = vmpackc.low %vm792_vm4, %vm792_vm4 }
 0x19b   : > { %1697 = vmatprep.mubr.msk.f32.mxu1 %vm1882_vm1, %v1883_v58 }
 0x259   : > { %v2078_v2 = vpop.f32.mrb[0].mxu1 }
 0x25a   : > { %v2080_v3 = vpop.f32.mrb[1].mxu1 }
 0x25b   : > { %1044 = vrot.lane.b32.xlu1 %v2080_v3, %s1886_s23 }
 0x261   : > { %v2084_v4 = vpop.f32.mrb[2].mxu1 }
 0x262   : > { %v2086_v5 = vpop.f32.mrb[3].mxu1 }
 0x265   : > { %v1680_v6 = vpop.f32.mrb[4].mxu1 }
 0x266   : > { %965 = vperm.xlu0 %1807, %v1680_v6   ;;  %759 = vperm.xlu1 %1806, %v1680_v6   ;;  %v624_v7 = vpop.f32.mrb[5].mxu1 }
 0x269   : > { %v1683_v8 = vpop.f32.mrb[6].mxu1 }
 0x26a   : > { %1808 = vset.pattern.permute.xlu1 %v1887_v9  ;;  %v634_v10 = vpop.f32.mrb[7].mxu1 }
 0x26b   : > { %1184 = vperm.xlu1 %1808, %v1680_v6  }
 0x26d   : > { %v748_v11 = vpop.f32.mrb[8].mxu1 }
 0x26e   : > { %v1688_v12 = vpop.f32.mrb[9].mxu1  ;;  %v775_v17 = vrot.slane %v748_v11, %v774_v15  ;;  %v2110_v28 = vrot.slane %v748_v11, %v978_v24  ;;  %v1198_v35 = vrot.slane %v748_v11, %v1197_v29 }
 0x26f   : > { %1809 = vset.pattern.permute.xlu1 %v1884_v0 }
 0x270   : > { %754 = vperm.xlu1 %1809, %v624_v7  }
 0x274   : > { %1810 = vset.pattern.permute.xlu1 %v1885_v1 }
 0x275   : > { %961 = vperm.xlu1 %1810, %v624_v7  }
 0x279   : > { %1811 = vset.pattern.permute.xlu1 %v1887_v9 }
 0x27a   : > { %1180 = vperm.xlu1 %1811, %v624_v7  }
 0x27e   : > { %1812 = vset.pattern.permute.xlu1 %v1884_v0 }
 0x27f   : > { %769 = vperm.xlu1 %1812, %v1683_v8  }
 0x283   : > { %1813 = vset.pattern.permute.xlu1 %v1885_v1 }
 0x284   : > { %973 = vperm.xlu1 %1813, %v1683_v8  }
 0x288   : > { %1814 = vset.pattern.permute.xlu1 %v1887_v9 }
 0x289   : > { %1192 = vperm.xlu1 %1814, %v1683_v8  }
 0x28d   : > { %1815 = vset.pattern.permute.xlu1 %v1884_v0 }
 0x28e   : > { %764 = vperm.xlu1 %1815, %v634_v10  }
 0x292   : > { %1816 = vset.pattern.permute.xlu1 %v1885_v1 }
 0x293   : > { %969 = vperm.xlu1 %1816, %v634_v10  }
 0x297   : > { %1817 = vset.pattern.permute.xlu1 %v1887_v9 }
 0x298   : > { %1188 = vperm.xlu1 %1817, %v634_v10  }
 0x29c   : > { %1259 = vrot.lane.b32.xlu1 %v2080_v3, %s1888_s24 }
 0x2a0   : > { %1048 = vrot.lane.b32.xlu1 %v2086_v5, %s1886_s23 }
 0x2cd   : > { %v2099_v16 = vpop.permute.xlu1 %1044 }
 0x2e5   : > { %v760_v18 = vpop.permute.xlu1 %759  ;;  %v966_v53 = vpop.permute.xlu0 %965 }
 0x2e6   : > { %v777_v19 = vadd.f32 %v775_v17, %v760_v18  ;;  %v981_v56 = vadd.f32 %v2110_v28, %v966_v53 }
 0x2e8   : > { %v785_v20 = vmul.f32 0.2, %v777_v19  ;;  %vm781_vm3 = vcmp.gt.f32.partialorder %v777_v19, 0.0  ;;  %v989_v57 = vmul.f32 0.2, %v981_v56  ;;  %vm985_vm10 = vcmp.gt.f32.partialorder %v981_v56, 0.0 }
 0x2ea   : > { %v1185_v21 = vpop.permute.xlu1 %1184  ;;  %v2103_v22 = vsel %vm781_vm3, %v777_v19, %v785_v20  ;;  %v2138_v62 = vsel %vm985_vm10, %v981_v56, %v989_v57 }
 0x2eb   : > { %v796_v23 = vsel %vm792_vm4, %v2103_v22, -inf  ;;  %v1200_v59 = vadd.f32 %v1198_v35, %v1185_v21  ;;  %v999_v63 = vsel %vm792_vm4, %v2138_v62, -inf }
 0x2ec   : > { %797 = vmax.xlane.f32.xlu0 %v796_v23 }
 0x2ed   : > { %v1208_v60 = vmul.f32 0.2, %v1200_v59  ;;  %vm1204_vm11 = vcmp.gt.f32.partialorder %v1200_v59, 0.0 }
 0x2ef   : > { %v755_v25 = vpop.permute.xlu1 %754  ;;  %v2142_v6 = vsel %vm1204_vm11, %v1200_v59, %v1208_v60 }
 0x2f0   : > { %v776_v26 = vadd.f32 %v775_v17, %v755_v25  ;;  %v1218_v7 = vsel %vm792_vm4, %v2142_v6, -inf }
 0x2f2   : > { %v784_v27 = vmul.f32 0.2, %v776_v26  ;;  %vm780_vm5 = vcmp.gt.f32.partialorder %v776_v26, 0.0 }
 0x2f4   : > { %v962_v30 = vpop.permute.xlu1 %961  ;;  %v2113_v31 = vsel %vm780_vm5, %v776_v26, %v784_v27 }
 0x2f5   : > { %v980_v32 = vadd.f32 %v2110_v28, %v962_v30  ;;  %v793_v33 = vsel %vm792_vm4, %v2113_v31, -inf }
 0x2f6   : > { %794 = vmax.xlane.f32.xlu1 %v793_v33 }
 0x2f7   : > { %v988_v34 = vmul.f32 0.2, %v980_v32  ;;  %vm984_vm6 = vcmp.gt.f32.partialorder %v980_v32, 0.0 }
 0x2f9   : > { %v1181_v36 = vpop.permute.xlu1 %1180  ;;  %v2118_v37 = vsel %vm984_vm6, %v980_v32, %v988_v34 }
 0x2fa   : > { %v1199_v38 = vadd.f32 %v1198_v35, %v1181_v36  ;;  %v996_v39 = vsel %vm792_vm4, %v2118_v37, -inf }
 0x2fb   : > { %997 = vmax.xlane.f32.xlu1 %v996_v39 }
 0x2fc   : > { %v1207_v40 = vmul.f32 0.2, %v1199_v38  ;;  %vm1203_vm7 = vcmp.gt.f32.partialorder %v1199_v38, 0.0 }
 0x2fe   : > { %v770_v41 = vpop.permute.xlu1 %769  ;;  %v2122_v42 = vsel %vm1203_vm7, %v1199_v38, %v1207_v40 }
 0x2ff   : > { %v779_v43 = vadd.f32 %v775_v17, %v770_v41  ;;  %v1215_v44 = vsel %vm792_vm4, %v2122_v42, -inf }
 0x300   : > { %1216 = vmax.xlane.f32.xlu1 %v1215_v44 }
 0x301   : > { %v787_v45 = vmul.f32 0.2, %v779_v43  ;;  %vm783_vm8 = vcmp.gt.f32.partialorder %v779_v43, 0.0 }
 0x302   : > { %1046 = vrot.lane.b32.xlu0 %v2078_v2, %s1886_s23 }
 0x303   : > { %v974_v46 = vpop.permute.xlu1 %973  ;;  %v2128_v47 = vsel %vm783_vm8, %v779_v43, %v787_v45 }
 0x304   : > { %v802_v48 = vsel %vm792_vm4, %v2128_v47, -inf  ;;  %v983_v61 = vadd.f32 %v2110_v28, %v974_v46 }
 0x305   : > { %803 = vmax.xlane.f32.xlu1 %v802_v48 }
 0x306   : > { %v991_v0 = vmul.f32 0.2, %v983_v61  ;;  %vm987_vm12 = vcmp.gt.f32.partialorder %v983_v61, 0.0 }
 0x308   : > { %v1193_v49 = vpop.permute.xlu1 %1192  ;;  %v2148_v10 = vsel %vm987_vm12, %v983_v61, %v991_v0  ;;  %v1889_v61 = vmov 0.0|0.0  }
 0x309   : > { %v1202_v1 = vadd.f32 %v1198_v35, %v1193_v49  ;;  %v1005_v11 = vsel %vm792_vm4, %v2148_v10, -inf  ;;  %1754 = vmatprep.subr.bf16.mxu1 %v1889_v61  ;;  %1762 = vmatprep.subr.bf16.mxu0 %v1889_v61 }
 0x30b   : > { %v1210_v8 = vmul.f32 0.2, %v1202_v1  ;;  %vm1206_vm13 = vcmp.gt.f32.partialorder %v1202_v1, 0.0 }
 0x30d   : > { %v765_v50 = vpop.permute.xlu1 %764  ;;  %v2152_v12 = vsel %vm1206_vm13, %v1202_v1, %v1210_v8 }
 0x30e   : > { %v778_v51 = vadd.f32 %v775_v17, %v765_v50  ;;  %v1224_v13 = vsel %vm792_vm4, %v2152_v12, -inf }
 0x310   : > { %v786_v52 = vmul.f32 0.2, %v778_v51  ;;  %vm782_vm9 = vcmp.gt.f32.partialorder %v778_v51, 0.0 }
 0x312   : > { %v2132_v54 = vsel %vm782_vm9, %v778_v51, %v786_v52  ;;  %v970_v17 = vpop.permute.xlu1 %969 }
 0x313   : > { %v799_v55 = vsel %vm792_vm4, %v2132_v54, -inf  ;;  %v982_v18 = vadd.f32 %v2110_v28, %v970_v17 }
 0x314   : > { %800 = vmax.xlane.f32.xlu1 %v799_v55 }
 0x315   : > { %v990_v20 = vmul.f32 0.2, %v982_v18  ;;  %vm986_vm14 = vcmp.gt.f32.partialorder %v982_v18, 0.0 }
 0x317   : > { %v1189_v19 = vpop.permute.xlu1 %1188  ;;  %v2159_v25 = vsel %vm986_vm14, %v982_v18, %v990_v20 }
 0x318   : > { %v1201_v21 = vadd.f32 %v1198_v35, %v1189_v19  ;;  %v1002_v26 = vsel %vm792_vm4, %v2159_v25, -inf }
 0x31a   : > { %v1209_v23 = vmul.f32 0.2, %v1201_v21  ;;  %vm1205_vm15 = vcmp.gt.f32.partialorder %v1201_v21, 0.0 }
 0x31b   : > { %v2171_v29 = vpop.permute.xlu1 %1259 }
 0x31c   : > { %v2165_v27 = vsel %vm1205_vm15, %v1201_v21, %v1209_v23 }
 0x31d   : > { %v1221_v28 = vsel %vm792_vm4, %v2165_v27, -inf }
 0x31f   : > { %v2174_v34 = vpop.permute.xlu1 %1048 }
 0x321   : > { %1000 = vmax.xlane.f32.xlu0 %v999_v63 }
 0x325   : > { %1261 = vrot.lane.b32.xlu1 %v2078_v2, %s1888_s24  ;;  %1219 = vmax.xlane.f32.xlu0 %v1218_v7 }
 0x329   : > { %1006 = vmax.xlane.f32.xlu0 %v1005_v11 }
 0x32d   : > { %1225 = vmax.xlane.f32.xlu0 %v1224_v13 }
 0x343   : > { %1050 = vrot.lane.b32.xlu0 %v2084_v4, %s1886_s23  ;;  %s1605_s23 = sshll.u32 %s2339_s28, 5 }
 0x344   : > { %s305_s26 = scalar_lea.vmem %s2335_s8, %s1605_s23 }
 0x347   : > { %1265 = vrot.lane.b32.xlu0 %v2084_v4, %s1888_s24 }
 0x349   : > { %1003 = vmax.xlane.f32.xlu1 %v1002_v26 }
 0x34d   : > { %1222 = vmax.xlane.f32.xlu1 %v1221_v28 }
 0x35e   : > { %1263 = vrot.lane.b32.xlu1 %v2086_v5, %s1888_s24 }
 0x379   : > { %v798_v30 = vpop.xlane.xlu0 %797 }
 0x37a   : > { %v806_v32 = vsub.f32 %v2103_v22, %v798_v30 }
 0x37c   : > { %v811_v33 = vmul.f32 1.442695, %v806_v32 }
 0x37d   : > { %v1047_v52 = vpop.permute.xlu0 %1046 }
 0x37e   : > { %1820 = vpow2.f32 %v811_v33 }
 0x383   : > { %v795_v35 = vpop.xlane.xlu1 %794 }
 0x384   : > { %v805_v36 = vsub.f32 %v2113_v31, %v795_v35 }
 0x386   : > { %v809_v38 = vmul.f32 1.442695, %v805_v36 }
 0x388   : > { %v2177_v39 = vpop.eup %1820  ;;  %1822 = vpow2.f32 %v809_v38  ;;  %v998_v40 = vpop.xlane.xlu1 %997 }
 0x389   : > { %v1008_v41 = vsub.f32 %v2118_v37, %v998_v40  ;;  %v820_v43 = vsel %vm792_vm4, %v2177_v39, 0.0 }
 0x38a   : > { %821 = vadd.xlane.f32.xlu0 %v820_v43 }
 0x38b   : > { %v1012_v44 = vmul.f32 1.442695, %v1008_v41 }
 0x38d   : > { %1824 = vpow2.f32 %v1012_v44  ;;  %v1217_v46 = vpop.xlane.xlu1 %1216 }
 0x38e   : > { %v1227_v57 = vsub.f32 %v2122_v42, %v1217_v46 }
 0x390   : > { %v1231_v0 = vmul.f32 1.442695, %v1227_v57 }
 0x392   : > { %v2182_v22 = vpop.eup %1822  ;;  %v804_v37 = vpop.xlane.xlu1 %803 }
 0x393   : > { %v817_v45 = vsel %vm792_vm4, %v2182_v22, 0.0 }
 0x394   : > { %818 = vadd.xlane.f32.xlu1 %v817_v45 }
 0x397   : > { %v2186_v31 = vpop.eup %1824 }
 0x398   : > { %v1020_v48 = vsel %vm792_vm4, %v2186_v31, 0.0 }
 0x399   : > { %1021 = vadd.xlane.f32.xlu1 %v1020_v48 }
 0x3a1   : > { %v801_v49 = vpop.xlane.xlu1 %800 }
 0x3a2   : > { %v807_v50 = vsub.f32 %v2132_v54, %v801_v49 }
 0x3a4   : > { %v813_v51 = vmul.f32 1.442695, %v807_v50 }
 0x3a5   : > { %v1262_v32 = vpop.permute.xlu1 %1261 }
 0x3a6   : > { %1826 = vpow2.f32 %v813_v51 }
 0x3ae   : > { %v1001_v53 = vpop.xlane.xlu0 %1000 }
 0x3af   : > { %v1009_v55 = vsub.f32 %v2138_v62, %v1001_v53  ;;  %v808_v62 = vsub.f32 %v2128_v47, %v804_v37 }
 0x3b0   : > { %v2192_v56 = vpop.eup %1826 }
 0x3b1   : > { %v1014_v59 = vmul.f32 1.442695, %v1009_v55  ;;  %v823_v60 = vsel %vm792_vm4, %v2192_v56, 0.0  ;;  %v815_v42 = vmul.f32 1.442695, %v808_v62 }
 0x3b2   : > { %824 = vadd.xlane.f32.xlu1 %v823_v60  ;;  %v1220_v54 = vpop.xlane.xlu0 %1219 }
 0x3b3   : > { %1828 = vpow2.f32 %v1014_v59  ;;  %v1228_v63 = vsub.f32 %v2142_v6, %v1220_v54 }
 0x3b5   : > { %v1233_v1 = vmul.f32 1.442695, %v1228_v63 }
 0x3b6   : > { %v1007_v7 = vpop.xlane.xlu0 %1006 }
 0x3b7   : > { %1830 = vpow2.f32 %v1233_v1  ;;  %v1011_v8 = vsub.f32 %v2148_v10, %v1007_v7 }
 0x3b8   : > { %1832 = vpow2.f32 %v1231_v0 }
 0x3b9   : > { %1834 = vpow2.f32 %v815_v42  ;;  %v1018_v17 = vmul.f32 1.442695, %v1011_v8 }
 0x3ba   : > { %v1226_v11 = vpop.xlane.xlu0 %1225 }
 0x3bb   : > { %v1230_v18 = vsub.f32 %v2152_v12, %v1226_v11  ;;  %1836 = vpow2.f32 %v1018_v17 }
 0x3bd   : > { %v2202_v13 = vpop.eup %1828  ;;  %v1237_v47 = vmul.f32 1.442695, %v1230_v18 }
 0x3be   : > { %v1023_v6 = vsel %vm792_vm4, %v2202_v13, 0.0 }
 0x3bf   : > { %1024 = vadd.xlane.f32.xlu0 %v1023_v6  ;;  %1838 = vpow2.f32 %v1237_v47 }
 0x3c1   : > { %v2207_v19 = vpop.eup %1830 }
 0x3c2   : > { %v1242_v20 = vsel %vm792_vm4, %v2207_v19, 0.0  ;;  %v2211_v21 = vpop.eup %1832 }
 0x3c3   : > { %1243 = vadd.xlane.f32.xlu0 %v1242_v20  ;;  %v1239_v10 = vsel %vm792_vm4, %v2211_v21, 0.0  ;;  %v2215_v23 = vpop.eup %1834 }
 0x3c4   : > { %v826_v12 = vsel %vm792_vm4, %v2215_v23, 0.0 }
 0x3c5   : > { %v2219_v26 = vpop.eup %1836 }
 0x3c6   : > { %v1029_v28 = vsel %vm792_vm4, %v2219_v26, 0.0 }
 0x3c7   : > { %1240 = vadd.xlane.f32.xlu0 %v1239_v10 }
 0x3c9   : > { %v2223_v30 = vpop.eup %1838 }
 0x3ca   : > { %v1248_v33 = vsel %vm792_vm4, %v2223_v30, 0.0 }
 0x3cb   : > { %827 = vadd.xlane.f32.xlu0 %v826_v12 }
 0x3cf   : > { %1030 = vadd.xlane.f32.xlu0 %v1029_v28 }
 0x3d3   : > { %1249 = vadd.xlane.f32.xlu0 %v1248_v33 }
 0x3d6   : > { %v1004_v35 = vpop.xlane.xlu1 %1003 }
 0x3d7   : > { %v1010_v36 = vsub.f32 %v2159_v25, %v1004_v35  ;;  %v1051_v25 = vpop.permute.xlu0 %1050 }
 0x3d9   : > { %v1016_v38 = vmul.f32 1.442695, %v1010_v36  ;;  %v1399_v36 = vld [vmem:[%s2333_s6 + $0x8] sm:$0xff] }
 0x3da   : > { %v1223_v40 = vpop.xlane.xlu1 %1222 }
 0x3db   : > { %1840 = vpow2.f32 %v1016_v38  ;;  %v1229_v41 = vsub.f32 %v2165_v27, %v1223_v40  ;;  %v1266_v37 = vpop.permute.xlu0 %1265  ;;  %v1400_v40 = vld [vmem:[%s2333_s6 + $0x10] sm:$0xff] }
 0x3dd   : > { %v1235_v43 = vmul.f32 1.442695, %v1229_v41 }
 0x3de   : > { %v1264_v27 = vpop.permute.xlu1 %1263 }
 0x3df   : > { %1842 = vpow2.f32 %v1235_v43  ;;  %v1405_v43 = vld [vmem:[%s2333_s6 + $0x38] sm:$0xff] }
 0x3e5   : > { %v2229_v44 = vpop.eup %1840 }
 0x3e6   : > { %v1026_v45 = vsel %vm792_vm4, %v2229_v44, 0.0 }
 0x3e7   : > { %1027 = vadd.xlane.f32.xlu1 %v1026_v45  ;;  %v1402_v45 = vld [vmem:[%s2333_s6 + $0x20] sm:$0xff] }
 0x3e9   : > { %v2233_v46 = vpop.eup %1842 }
 0x3ea   : > { %v1245_v48 = vsel %vm792_vm4, %v2233_v46, 0.0 }
 0x3eb   : > { %1246 = vadd.xlane.f32.xlu1 %v1245_v48 }
 0x400   : > { %1056 = vxpose.xlu0.b32.start [1/4] (short) (narrow) %v2099_v16, 8 }
 0x404   : > { %1057 = vxpose.xlu0.b32.cont [2/4] (short) (narrow) %v1047_v52, 8 }
 0x408   : > { %1058 = vxpose.xlu0.b32.cont [3/4] (short) (narrow) %v2174_v34, 8 }
 0x40c   : > { %1059 = vxpose.xlu0.b32.end [4/4] (short) (narrow) %v1051_v25, 8 }
 0x410   : > { %1271 = vxpose.xlu0.b32.start [1/4] (short) (narrow) %v2171_v29, 8 }
 0x414   : > { %1272 = vxpose.xlu0.b32.cont [2/4] (short) (narrow) %v1262_v32, 8 }
 0x417   : > { %v822_v49 = vpop.xlane.xlu0 %821 }
 0x418   : > { %1273 = vxpose.xlu0.b32.cont [3/4] (short) (narrow) %v1264_v27, 8  ;;  %1844 = vrcp.f32 %v822_v49 }
 0x41c   : > { %1274 = vxpose.xlu0.b32.end [4/4] (short) (narrow) %v1266_v37, 8 }
 0x41e   : > { %837 = vxpose.xlu1.b32.start [1/4] (short) (narrow) %v2080_v3, 8 }
 0x421   : > { %v819_v50 = vpop.xlane.xlu1 %818 }
 0x422   : > { %1846 = vrcp.f32 %v819_v50  ;;  %838 = vxpose.xlu1.b32.cont [2/4] (short) (narrow) %v2078_v2, 8  ;;  %v1845_v16 = vpop.eup %1844 }
 0x423   : > { %v834_v29 = vmul.f32 %v1845_v16, %v2177_v39 }
 0x426   : > { %839 = vxpose.xlu1.b32.cont [3/4] (short) (narrow) %v2086_v5, 8  ;;  %v1022_v2 = vpop.xlane.xlu1 %1021 }
 0x427   : > { %1848 = vrcp.f32 %v1022_v2 }
 0x42a   : > { %840 = vxpose.xlu1.b32.end [4/4] (short) (narrow) %v2084_v4, 8 }
 0x42c   : > { %v1847_v34 = vpop.eup %1846 }
 0x42d   : > { %v833_v51 = vmul.f32 %v1847_v34, %v2182_v22 }
 0x42f   : > { %v1755_v3 = vpack.c.bf16 %v834_v29, %v833_v51 }
 0x431   : > { %1757 = vmatpush3.bf16.xpose.msk.msra.mxu1 %vm2248_vm2, %v1755_v3  ;;  %v1849_v53 = vpop.eup %1848 }
 0x432   : > { %1758 = vmatprep.subr.bf16.mxu1 %v1889_v61  ;;  %v1036_v57 = vmul.f32 %v1849_v53, %v2186_v31 }
 0x43f   : > { %v825_v39 = vpop.xlane.xlu1 %824 }
 0x445   : > { %1818 = vset.pattern.permute.xlu0 %v1887_v9 }
 0x44c   : > { %v1025_v4 = vpop.xlane.xlu0 %1024 }
 0x44d   : > { %1850 = vrcp.f32 %v1025_v4 }
 0x44e   : > { %1852 = vrcp.f32 %v825_v39 }
 0x450   : > { %v1244_v5 = vpop.xlane.xlu0 %1243 }
 0x454   : > { %v1241_v22 = vpop.xlane.xlu0 %1240 }
 0x457   : > { %v1851_v55 = vpop.eup %1850 }
 0x458   : > { %v1037_v59 = vmul.f32 %v1851_v55, %v2202_v13  ;;  %v828_v60 = vpop.xlane.xlu0 %827  ;;  %v1853_v9 = vpop.eup %1852 }
 0x459   : > { %1854 = vrcp.f32 %v828_v60  ;;  %v835_v0 = vmul.f32 %v1853_v9, %v2192_v56 }
 0x45a   : > { %v1763_v54 = vpack.c.bf16 %v1037_v59, %v1036_v57 }
 0x45c   : > { %1765 = vmatpush3.bf16.xpose.msk.msra.mxu0 %vm2248_vm2, %v1763_v54  ;;  %v1031_v31 = vpop.xlane.xlu0 %1030 }
 0x45d   : > { %1766 = vmatprep.subr.bf16.mxu0 %v1889_v61  ;;  %1856 = vrcp.f32 %v1031_v31 }
 0x460   : > { %v1250_v56 = vpop.xlane.xlu0 %1249 }
 0x463   : > { %v1855_v63 = vpop.eup %1854 }
 0x464   : > { %v836_v62 = vmul.f32 %v1855_v63, %v2215_v23  ;;  %v1406_v63 = vld [vmem:[%s2334_s7] sm:$0x3] }
 0x466   : > { %v1759_v1 = vpack.c.bf16 %v836_v62, %v835_v0  ;;  %v1411_v0 = vrot.slane %v1406_v63, %v774_v15  ;;  %v1415_v62 = vrot.slane %v1406_v63, %v978_v24 }
 0x467   : > { %v1857_v42 = vpop.eup %1856 }
 0x468   : > { %1761 = vmatpush3.bf16.xpose.msk.msra.mxu1 %vm2248_vm2, %v1759_v1  ;;  %v1039_v11 = vmul.f32 %v1857_v42, %v2219_v26 }
 0x469   : > { %1770 = vmatprep.subr.bf16.mxu1 %v1889_v61 }
 0x474   : > { %v1028_v7 = vpop.xlane.xlu1 %1027 }
 0x475   : > { %1858 = vrcp.f32 %v1028_v7 }
 0x476   : > { %1860 = vrcp.f32 %v1241_v22 }
 0x477   : > { %1862 = vrcp.f32 %v1244_v5 }
 0x478   : > { %v1247_v6 = vpop.xlane.xlu1 %1246 }
 0x479   : > { %1864 = vrcp.f32 %v1247_v6 }
 0x47a   : > { %1866 = vrcp.f32 %v1250_v56 }
 0x47f   : > { %v1859_v8 = vpop.eup %1858 }
 0x480   : > { %v1038_v13 = vmul.f32 %v1859_v8, %v2229_v44  ;;  %v1072_v18 = vpop.trf.xlu0  ;;  %v1861_v47 = vpop.eup %1860 }
 0x481   : > { %v1863_v20 = vpop.eup %1862  ;;  %v1255_v10 = vmul.f32 %v1861_v47, %v2211_v21 }
 0x482   : > { %v1767_v17 = vpack.c.bf16 %v1039_v11, %v1038_v13  ;;  %v1256_v23 = vmul.f32 %v1863_v20, %v2207_v19 }
 0x483   : > { %v1865_v28 = vpop.eup %1864 }
 0x484   : > { %1769 = vmatpush3.bf16.xpose.msk.msra.mxu0 %vm2248_vm2, %v1767_v17  ;;  %v1771_v26 = vpack.c.bf16 %v1256_v23, %v1255_v10  ;;  %v1867_v32 = vpop.eup %1866  ;;  %v1257_v33 = vmul.f32 %v1865_v28, %v2233_v46  ;;  %v1404_v46 = vld [vmem:[%s2333_s6 + $0x30] sm:$0xff] }
 0x485   : > { %v1258_v21 = vmul.f32 %v1867_v32, %v2223_v30  ;;  %v1398_v30 = vld [vmem:[%s2333_s6] sm:$0xff]  ;;  %v1784_v48 = vpack.c.bf16 %v1404_v46, %v1402_v45 }
 0x486   : > { %v1780_v41 = vpack.c.bf16 %v1400_v40, %v1398_v30 }
 0x487   : > { %v1775_v35 = vpack.c.bf16 %v1258_v21, %v1257_v33 }
 0x48b   : > { %1709 = vmatmul.mubr.msk.f32.vlgmr.msra.gmra.mrb[2].mxu0 %vm792_vm4, %v1072_v18 }
 0x48c   : > { %1488 = vmatprep.mubr.f32.mxu0 %v1883_v58 }
 0x490   : > { %v1287_v19 = vpop.trf.xlu0 }
 0x49e   : > { %v853_v12 = vpop.trf.xlu1 }
 0x49f   : > { %1698 = vmatmul.mubr.msk.f32.vlgmr.msra.gmra.mrb[10].mxu1 %vm792_vm4, %v853_v12 }
 0x4a0   : > { %1773 = vmatpush3.bf16.xpose.msk.msra.mxu1 %vm2248_vm2, %v1771_v26  ;;  %1719 = vmatprep.mubr.msk.f32.mxu1 %vm1882_vm1, %v1883_v58 }
 0x4a1   : > { %1774 = vmatprep.subr.bf16.mxu1 %v1889_v61  ;;  %v1401_v61 = vld [vmem:[%s2333_s6 + $0x18] sm:$0xff] }
 0x4a2   : > { %v1778_v38 = vpack.c.bf16 %v1401_v61, %v1399_v36 }
 0x4a4   : > { %1779 = vmatprep.subr.bf16.mxu0 %v1778_v38 }
 0x4a5   : > { %1781 = vmatpush1.bf16.msra.mxu0 %v1780_v41 }
 0x4a8   : > { %1777 = vmatpush3.bf16.xpose.msk.msra.mxu1 %vm2248_vm2, %v1775_v35 }
 0x4a9   : > { %1786 = vmatprep.subr.bf16.mxu1 %v1778_v38 }
 0x4af   : > { %1720 = vmatmul.mubr.msk.f32.vlgmr.msra.gmra.mrb[12].mxu1 %vm792_vm4, %v1287_v19 }
 0x4b0   : > { %1494 = vmatprep.mubr.f32.mxu1 %v1883_v58  ;;  %v1403_v58 = vld [vmem:[%s2333_s6 + $0x28] sm:$0xff]  ;;  %1788 = vmatpush1.bf16.msra.mxu1 %v1780_v41 }
 0x4b1   : > { %v1782_v44 = vpack.c.bf16 %v1405_v43, %v1403_v58 }
 0x4b3   : > { %1783 = vmatprep.subr.bf16.mxu0 %v1782_v44  ;;  %1787 = vmatprep.subr.bf16.mxu1 %v1782_v44 }
 0x4b4   : > { %1785 = vmatpush1.bf16.msra.mxu0 %v1784_v48  ;;  %1789 = vmatpush1.bf16.msra.mxu1 %v1784_v48 }
 0x55e   : > { %v1169_v25 = vpop.f32.mrb[2].mxu0 }
 0x55f   : > { %v1710_v27 = vpop.f32.mrb[3].mxu0  ;;  %v1174_v37 = vmin.f32 %v1169_v25, 0.0  ;;  %vm1173_vm1 = vcmp.gt.f32.partialorder %v1169_v25, 0.0 }
 0x561   : > { %v1175_v49 = vmul.f32 1.442695, %v1174_v37 }
 0x563   : > { %1868 = vpow2.f32 %v1175_v49 }
 0x56d   : > { %v1869_v51 = vpop.eup %1868 }
 0x56e   : > { %v1593_v52 = vadd.f32 -1.0, %v1869_v51 }
 0x570   : > { %v1178_v3 = vsel %vm1173_vm1, %v1169_v25, %v1593_v52 }
 0x571   : > { %v1395_v39 = vrot.slane %v1178_v3, 4 }
 0x572   : > { %v950_v50 = vpop.f32.mrb[10].mxu1 }
 0x573   : > { %v955_v16 = vmin.f32 %v950_v50, 0.0  ;;  %v1699_v34 = vpop.f32.mrb[11].mxu1  ;;  %vm954_vm3 = vcmp.gt.f32.partialorder %v950_v50, 0.0 }
 0x575   : > { %v956_v29 = vmul.f32 1.442695, %v955_v16 }
 0x577   : > { %1870 = vpow2.f32 %v956_v29 }
 0x581   : > { %v1871_v2 = vpop.eup %1870 }
 0x582   : > { %v1587_v4 = vadd.f32 -1.0, %v1871_v2  ;;  %v1384_v5 = vpop.f32.mrb[12].mxu1 }
 0x583   : > { %v1389_v22 = vmin.f32 %v1384_v5, 0.0  ;;  %v1721_v53 = vpop.f32.mrb[13].mxu1  ;;  %vm1388_vm5 = vcmp.gt.f32.partialorder %v1384_v5, 0.0 }
 0x584   : > { %v959_v55 = vsel %vm954_vm3, %v950_v50, %v1587_v4 }
 0x585   : > { %v1390_v57 = vmul.f32 1.442695, %v1389_v22  ;;  %v1397_v59 = vsel %vm465_vm0, %v959_v55, %v1395_v39 }
 0x586   : > { %1600 = vmatmul.mubr.msk.f32.vlgmr.msra.gmra.mrb[4].mxu0 %vm792_vm4, %v1397_v59 }
 0x587   : > { %1872 = vpow2.f32 %v1390_v57 }
 0x591   : > { %v1873_v60 = vpop.eup %1872 }
 0x592   : > { %v1599_v54 = vadd.f32 -1.0, %v1873_v60 }
 0x594   : > { %v1393_v9 = vsel %vm1388_vm5, %v1384_v5, %v1599_v54 }
 0x595   : > { %1601 = vmatmul.mubr.msk.f32.vlgmr.msra.gmra.mrb[14].mxu1 %vm792_vm4, %v1393_v9 }
 0x659   : > { %v1490_v1 = vpop.f32.mrb[4].mxu0 }
 0x65a   : > { %v1491_v31 = vadd.f32 %v1490_v1, %v1411_v0  ;;  %v1492_v7 = vpop.f32.mrb[5].mxu0 }
 0x65b   : > { %v1493_v42 = vadd.f32 %v1492_v7, %v1415_v62 }
 0x65c   : > { %1501 = vst [vmem:[%s305_s26] sm:$0xff] %v1491_v31 }
 0x65d   : > { %1502 = vst [vmem:[%s305_s26 + $0x8] sm:$0xff] %v1493_v42 }
 0x668   : > { %v1496_v8 = vpop.f32.mrb[14].mxu1 }
 0x669   : > { %v1497_v11 = vadd.f32 %v1496_v8, %v1411_v0  ;;  %v1498_v13 = vpop.f32.mrb[15].mxu1 }
 0x66a   : > { %v1499_v17 = vadd.f32 %v1498_v13, %v1415_v62 }
 0x66b   : > { %1503 = vst [vmem:[%s305_s26 + $0x10] sm:$0xf] %v1497_v11 }
 0x66c   : > { %1504 = vst [vmem:[%s305_s26 + $0x18] sm:$0xf] %v1499_v17 }
 0x66d PF: > { %s18_s27 = sadd.s32 1, %s1880_s27  }
 0x66e   : > { %p15_p4 = scmp.ge.s32.totalorder %s18_s27, 4  }
 0x670   :  { %17 = sbr.rel (!%p15_p4) target bundleno = 1 (0x1), region = 82 }

</bundles_post_ra>
